<compile_context>
chip_gen: v7x
topology: tpu7x:2x2x1
jax: 0.10.0
libtpu: 0.0.40
codegen_flags: <defaults>
</compile_context>

<pallas_src>
import functools

import jax
import jax.numpy as jnp
from jax import lax
from jax.experimental import pallas as pl
from jax.experimental.pallas import tpu as pltpu

NEG_SLOPE = 0.01   # nn.LeakyReLU default
BN_EPS = 1e-5      # nn.BatchNorm2d default
LANE = 128


def _round_up(x, m):
    return ((x + m - 1) // m) * m


def _vmem_capacity_bytes():
    """Physical VMEM of the local chip, with a v7x-safe fallback."""
    try:
        cap = int(pltpu.get_tpu_info().vmem_capacity_bytes)
        if cap > 0:
            return cap
    except Exception:
        pass
    return 64 << 20


def _vmem_limit(est_bytes, cap):
    lim = max(32 << 20, est_bytes + (8 << 20))
    return int(min(lim, cap - (2 << 20)))


def _pick_tr(N, Ho, Wo, C, Cp, budget):
    """Output rows per grid block: largest tile fitting the VMEM budget, with
    at least two grid blocks so a 2-TensorCore part keeps both cores busy."""
    def est(tr):
        phase = 4 * (tr + 1) * (Wo + 1) * C * 2 * 2   # 4 bf16 phase tiles, x2 buffers
        wres = 2 * 9 * C * Cp * 2                     # resident weight (counted x2)
        ytile = tr * Wo * Cp * 2 * 2                  # bf16 y tile, x2 buffers
        acc = tr * Wo * Cp * 4                        # f32 accumulator
        taps = 2 * tr * Wo * C * 2                    # transient tap slices
        otile = tr * Wo * Cp * 4 * 2                  # pass-2 f32 output tile, x2
        return phase + wres + ytile + acc + taps + otile + 16 * Cp * 4

    tr = max(1, min(Ho, 256))
    while tr > 1 and est(tr) > budget:
        tr = (tr + 1) // 2
    # TODO(synk): for very large C where est(1) still exceeds the budget, add
    # Cout / K grid tiling (arbitrary axis + accumulator) instead of only
    # shrinking the row tile.
    if N * int(pl.cdiv(Ho, tr)) < 2 and Ho >= 2:      # guarantee >= 2 grid blocks
        tr = int(pl.cdiv(Ho, 2))
    return tr, est(tr)


# ----------------------------------------------------------------------------
# Pass 1: conv (in-VMEM im2col from 4 phase tiles) + per-tile BN statistics
# ----------------------------------------------------------------------------
def _conv_stats_kernel(pee_ref, peo_ref, poe_ref, poo_ref, w_ref,
                       y_ref, s_ref, ss_ref, *, tr, wo, ho):
    """Phase tiles: (tr+1, wo+1, C) bf16 (even/odd row x col phases with a
    1-row / 1-col halo).  w: (9, C, Cp) bf16, resident.  Outputs per tile:
    y: (tr*wo, Cp) bf16, s/ss: (1, Cp) f32 channel sum / sum-of-squares."""
    c = w_ref.shape[1]
    cp = y_ref.shape[-1]
    phase = ((pee_ref, peo_ref), (poe_ref, poo_ref))

    acc = jnp.zeros((tr * wo, cp), jnp.float32)
    for kh in range(3):
        for kw in range(3):
            ph = phase[kh % 2][kw % 2]
            dr, dc = kh // 2, kw // 2
            tap = ph[dr:dr + tr, dc:dc + wo, :].reshape(tr * wo, c)
            acc = acc + jnp.dot(tap, w_ref[3 * kh + kw],
                                preferred_element_type=jnp.float32)

    if ho % tr != 0:
        # Zero rows belonging to padded output rows so the BN statistics (and
        # the unused tail of y) stay exact.
        row = lax.broadcasted_iota(jnp.int32, (tr * wo, 1), 0) // wo
        valid = (pl.program_id(1) * tr + row) < ho
        acc = jnp.where(valid, acc, 0.0)

    y_ref[...] = acc.astype(y_ref.dtype)
    s_ref[...] = jnp.sum(acc, axis=0, keepdims=True)
    ss_ref[...] = jnp.sum(acc * acc, axis=0, keepdims=True)


# ----------------------------------------------------------------------------
# Pass 2: y * scale + shift, then LeakyReLU
# ----------------------------------------------------------------------------
def _bn_lrelu_kernel(y_ref, scale_ref, shift_ref, o_ref):
    """y: (tr*wo, Cp) bf16, scale/shift: (1, Cp) f32, o: (tr*wo, Cp) f32."""
    v = y_ref[...].astype(jnp.float32) * scale_ref[...] + shift_ref[...]
    o_ref[...] = jnp.where(v >= 0, v, NEG_SLOPE * v)


def down_forward(x_nchw, weight_oihw):
    """x_nchw: (N, C, H, W) f32, weight_oihw: (C, C, 3, 3) f32 -> (N, C, Ho, Wo) f32."""
    N, C, H, W = x_nchw.shape
    Ho = (H - 1) // 2 + 1
    Wo = (W - 1) // 2 + 1

    # Lane-pad the output-channel dim only when it pays off (avoids the 128/C
    # intermediate inflation at small C; block dims equal to full array dims
    # are always legal).
    Cp = C if (C % LANE == 0 or C < LANE) else _round_up(C, LANE)

    # --- XLA glue: NCHW -> NHWC, reflect pad, stride-2 phase split -----------
    x = jnp.transpose(x_nchw, (0, 2, 3, 1))                          # (N,H,W,C)
    xp = jnp.pad(x, ((0, 0), (1, 1), (1, 1), (0, 0)), mode="reflect")
    xp = xp.astype(jnp.bfloat16)                                     # MXU dtype
    # zero-pad so every phase plane has exactly (Ho+1, Wo+1) pixels
    xp = jnp.pad(xp, ((0, 0), (0, 2 * Ho + 2 - (H + 2)),
                      (0, 2 * Wo + 2 - (W + 2)), (0, 0)))
    phases = [xp[:, 0::2, 0::2, :], xp[:, 0::2, 1::2, :],
              xp[:, 1::2, 0::2, :], xp[:, 1::2, 1::2, :]]            # 4x (N,Ho+1,Wo+1,C)

    # --- generation-aware tiling over output rows -----------------------------
    cap = _vmem_capacity_bytes()
    budget = cap // 2                                                # ~50% of physical VMEM
    TR, est = _pick_tr(N, Ho, Wo, C, Cp, budget)
    Gr = int(pl.cdiv(Ho, TR))
    vlim = _vmem_limit(est, cap)

    # --- halo row-blocking of the phase planes (duplicates 1 row per block) --
    Hpad = Gr * TR + 1
    row_idx = jnp.arange(Gr)[:, None] * TR + jnp.arange(TR + 1)[None, :]

    def _block_rows(ph):
        ph = jnp.pad(ph, ((0, 0), (0, Hpad - (Ho + 1)), (0, 0), (0, 0)))
        return jnp.take(ph, row_idx, axis=1)          # (N, Gr, TR+1, Wo+1, C)

    phases_b = [_block_rows(p) for p in phases]

    # --- per-tap weights: (Cout, Cin, kh, kw) -> (9, Cin, Cp) bf16 ------------
    w_taps = jnp.transpose(weight_oihw, (2, 3, 1, 0)).reshape(9, C, C)
    if Cp != C:
        w_taps = jnp.pad(w_taps, ((0, 0), (0, 0), (0, Cp - C)))
    w_taps = w_taps.astype(jnp.bfloat16)

    # --- pass 1: conv + per-tile stats (grid over (N, row-blocks)) -----------
    grid = (N, Gr)
    phase_spec = pl.BlockSpec((None, None, TR + 1, Wo + 1, C),
                              lambda n, r: (n, r, 0, 0, 0))
    # TODO(synk): pipeline_mode=pl.Buffered(1) on the weight spec (constant
    # index_map -> no re-DMA) would reclaim its second VMEM buffer at large C.
    w_spec = pl.BlockSpec((9, C, Cp), lambda n, r: (0, 0, 0))
    y_spec = pl.BlockSpec((None, None, TR * Wo, Cp), lambda n, r: (n, r, 0, 0))
    st_spec = pl.BlockSpec((None, None, 1, Cp), lambda n, r: (n, r, 0, 0))

    # TODO(synk): switch to pltpu.CORE_PARALLEL on the leading axis if v7x
    # profiling shows one TensorCore idle with plain "parallel".
    y_bf16, part_sum, part_sumsq = pl.pallas_call(
        functools.partial(_conv_stats_kernel, tr=TR, wo=Wo, ho=Ho),
        grid=grid,
        in_specs=[phase_spec, phase_spec, phase_spec, phase_spec, w_spec],
        out_specs=[y_spec, st_spec, st_spec],
        out_shape=[
            jax.ShapeDtypeStruct((N, Gr, TR * Wo, Cp), jnp.bfloat16),
            jax.ShapeDtypeStruct((N, Gr, 1, Cp), jnp.float32),
            jax.ShapeDtypeStruct((N, Gr, 1, Cp), jnp.float32),
        ],
        compiler_params=pltpu.CompilerParams(
            dimension_semantics=("parallel", "parallel"),
            vmem_limit_bytes=vlim),
    )(*phases_b, w_taps)

    # --- glue: total batch statistics -> per-channel scale / shift -----------
    m = float(N * Ho * Wo)
    tot_sum = jnp.sum(part_sum, axis=(0, 1))             # (1, Cp) f32
    tot_sumsq = jnp.sum(part_sumsq, axis=(0, 1))         # (1, Cp) f32
    mean = tot_sum / m
    var = jnp.maximum(tot_sumsq / m - mean * mean, 0.0)  # biased variance
    scale = lax.rsqrt(var + BN_EPS)
    shift = -mean * scale

    # --- pass 2: normalize + LeakyReLU (streaming, f32 output) ---------------
    vec_spec = pl.BlockSpec((1, Cp), lambda n, r: (0, 0))
    out_blk = pl.pallas_call(
        _bn_lrelu_kernel,
        grid=grid,
        in_specs=[y_spec, vec_spec, vec_spec],
        out_specs=y_spec,
        out_shape=jax.ShapeDtypeStruct((N, Gr, TR * Wo, Cp), jnp.float32),
        compiler_params=pltpu.CompilerParams(
            dimension_semantics=("parallel", "parallel"),
            vmem_limit_bytes=vlim),
    )(y_bf16, scale, shift)

    # --- glue: drop row/channel padding, back to NCHW f32 --------------------
    # TODO(synk): emit NHWC / bf16 directly if the consuming layer accepts it,
    # dropping this transpose (an extra HBM read+write of the output).
    out = out_blk.reshape(N, Gr * TR, Wo, Cp)[:, :Ho, :, :C]
    return jnp.transpose(out, (0, 3, 1, 2))


def _down_reference(x_nchw, weight_oihw):
    """Pure-JAX reference mirroring the kernel numerics (bf16 inputs/weights,
    f32 conv & statistics, bf16-rounded y before normalization)."""
    xp = jnp.pad(x_nchw, ((0, 0), (0, 0), (1, 1), (1, 1)), mode="reflect")
    xp = xp.astype(jnp.bfloat16).astype(jnp.float32)
    w = weight_oihw.astype(jnp.bfloat16).astype(jnp.float32)
    y = lax.conv_general_dilated(
        xp, w, window_strides=(2, 2), padding="VALID",
        dimension_numbers=("NCHW", "OIHW", "NCHW"))
    mean = jnp.mean(y, axis=(0, 2, 3), keepdims=True)
    var = jnp.mean(jnp.square(y - mean), axis=(0, 2, 3), keepdims=True)  # biased
    yq = y.astype(jnp.bfloat16).astype(jnp.float32)
    normed = (yq - mean) * lax.rsqrt(var + BN_EPS)
    return jnp.where(normed >= 0, normed, NEG_SLOPE * normed)


if __name__ == "__main__":
    key = jax.random.PRNGKey(0)
    kx, kw = jax.random.split(key)

    N, C, H, W = 2, 4, 16, 16
    x = jax.random.normal(kx, (N, C, H, W), dtype=jnp.float32)
    weight = 0.1 * jax.random.normal(kw, (C, C, 3, 3), dtype=jnp.float32)

    fwd = jax.jit(down_forward)
    out = jax.block_until_ready(fwd(x, weight))
    ref = jax.block_until_ready(_down_reference(x, weight))

    assert out.shape == (N, C, H // 2, W // 2), out.shape
    max_err = float(jnp.max(jnp.abs(out - ref)))
    assert jnp.allclose(out, ref, atol=2e-3, rtol=2e-3), max_err

    print("KERNEL_OK")
</pallas_src>

<mosaic_0001>
module attributes {stable_mosaic.version = 11 : i64} {
  func.func @_conv_stats_kernel(%arg0: i32, %arg1: i32, %arg2: memref<1x1x9x9x4xbf16, #tpu.memory_space<vmem>>, %arg3: memref<1x1x9x9x4xbf16, #tpu.memory_space<vmem>>, %arg4: memref<1x1x9x9x4xbf16, #tpu.memory_space<vmem>>, %arg5: memref<1x1x9x9x4xbf16, #tpu.memory_space<vmem>>, %arg6: memref<9x4x4xbf16, #tpu.memory_space<vmem>>, %arg7: memref<1x1x64x4xbf16, #tpu.memory_space<vmem>>, %arg8: memref<1x1x1x4xf32, #tpu.memory_space<vmem>>, %arg9: memref<1x1x1x4xf32, #tpu.memory_space<vmem>>) attributes {dimension_semantics = [#tpu.dimension_semantics<parallel>, #tpu.dimension_semantics<parallel>], iteration_bounds = array<i64: 2, 1>, scalar_prefetch = 0 : i64, scratch_operands = 0 : i64, tpu.core_type = #tpu.core_type<tc>, window_params = [{transform_indices = @transform_0, window_bounds = array<i64: 1, 1, 9, 9, 4>}, {transform_indices = @transform_1, window_bounds = array<i64: 1, 1, 9, 9, 4>}, {transform_indices = @transform_2, window_bounds = array<i64: 1, 1, 9, 9, 4>}, {transform_indices = @transform_3, window_bounds = array<i64: 1, 1, 9, 9, 4>}, {pipeline_mode = #tpu.pipeline_mode<synchronous>, transform_indices = @transform_4, window_bounds = array<i64: 9, 4, 4>}, {transform_indices = @transform_5, window_bounds = array<i64: 1, 1, 64, 4>}, {transform_indices = @transform_6, window_bounds = array<i64: 1, 1, 1, 4>}, {transform_indices = @transform_7, window_bounds = array<i64: 1, 1, 1, 4>}]} {
    %cst = arith.constant 0.000000e+00 : f32
    %0 = vector.broadcast %cst : f32 to vector<64x4xf32>
    %c0 = arith.constant 0 : index
    %c0_0 = arith.constant 0 : index
    %c0_1 = arith.constant 0 : index
    %c0_2 = arith.constant 0 : index
    %c0_3 = arith.constant 0 : index
    %1 = vector.load %arg2[%c0, %c0_0, %c0_1, %c0_2, %c0_3] : memref<1x1x9x9x4xbf16, #tpu.memory_space<vmem>>, vector<1x1x8x8x4xbf16>
    %2 = vector.shape_cast %1 : vector<1x1x8x8x4xbf16> to vector<8x8x4xbf16>
    %3 = vector.shape_cast %2 : vector<8x8x4xbf16> to vector<64x4xbf16>
    %c0_4 = arith.constant 0 : index
    %c0_5 = arith.constant 0 : index
    %c0_6 = arith.constant 0 : index
    %4 = vector.load %arg6[%c0_4, %c0_5, %c0_6] : memref<9x4x4xbf16, #tpu.memory_space<vmem>>, vector<1x4x4xbf16>
    %5 = vector.shape_cast %4 : vector<1x4x4xbf16> to vector<4x4xbf16>
    %cst_7 = arith.constant dense<0.000000e+00> : vector<64x4xf32>
    %6 = tpu.matmul %3, %5, %cst_7 {dimension_numbers = #tpu.dot_dimension_numbers<[1], [0], [0], [1], [0, 0, 1, 1], [], []>} : vector<64x4xbf16>, vector<4x4xbf16>, vector<64x4xf32> -> vector<64x4xf32>
    %7 = arith.addf %0, %6 : vector<64x4xf32>
    %c0_8 = arith.constant 0 : index
    %c0_9 = arith.constant 0 : index
    %c0_10 = arith.constant 0 : index
    %c0_11 = arith.constant 0 : index
    %c0_12 = arith.constant 0 : index
    %8 = vector.load %arg3[%c0_8, %c0_9, %c0_10, %c0_11, %c0_12] : memref<1x1x9x9x4xbf16, #tpu.memory_space<vmem>>, vector<1x1x8x8x4xbf16>
    %9 = vector.shape_cast %8 : vector<1x1x8x8x4xbf16> to vector<8x8x4xbf16>
    %10 = vector.shape_cast %9 : vector<8x8x4xbf16> to vector<64x4xbf16>
    %c1 = arith.constant 1 : index
    %c0_13 = arith.constant 0 : index
    %c0_14 = arith.constant 0 : index
    %11 = vector.load %arg6[%c1, %c0_13, %c0_14] : memref<9x4x4xbf16, #tpu.memory_space<vmem>>, vector<1x4x4xbf16>
    %12 = vector.shape_cast %11 : vector<1x4x4xbf16> to vector<4x4xbf16>
    %cst_15 = arith.constant dense<0.000000e+00> : vector<64x4xf32>
    %13 = tpu.matmul %10, %12, %cst_15 {dimension_numbers = #tpu.dot_dimension_numbers<[1], [0], [0], [1], [0, 0, 1, 1], [], []>} : vector<64x4xbf16>, vector<4x4xbf16>, vector<64x4xf32> -> vector<64x4xf32>
    %14 = arith.addf %7, %13 : vector<64x4xf32>
    %c0_16 = arith.constant 0 : index
    %c0_17 = arith.constant 0 : index
    %c0_18 = arith.constant 0 : index
    %c1_19 = arith.constant 1 : index
    %c0_20 = arith.constant 0 : index
    %15 = vector.load %arg2[%c0_16, %c0_17, %c0_18, %c1_19, %c0_20] : memref<1x1x9x9x4xbf16, #tpu.memory_space<vmem>>, vector<1x1x8x8x4xbf16>
    %16 = vector.shape_cast %15 : vector<1x1x8x8x4xbf16> to vector<8x8x4xbf16>
    %17 = vector.shape_cast %16 : vector<8x8x4xbf16> to vector<64x4xbf16>
    %c2 = arith.constant 2 : index
    %c0_21 = arith.constant 0 : index
    %c0_22 = arith.constant 0 : index
    %18 = vector.load %arg6[%c2, %c0_21, %c0_22] : memref<9x4x4xbf16, #tpu.memory_space<vmem>>, vector<1x4x4xbf16>
    %19 = vector.shape_cast %18 : vector<1x4x4xbf16> to vector<4x4xbf16>
    %cst_23 = arith.constant dense<0.000000e+00> : vector<64x4xf32>
    %20 = tpu.matmul %17, %19, %cst_23 {dimension_numbers = #tpu.dot_dimension_numbers<[1], [0], [0], [1], [0, 0, 1, 1], [], []>} : vector<64x4xbf16>, vector<4x4xbf16>, vector<64x4xf32> -> vector<64x4xf32>
    %21 = arith.addf %14, %20 : vector<64x4xf32>
    %c0_24 = arith.constant 0 : index
    %c0_25 = arith.constant 0 : index
    %c0_26 = arith.constant 0 : index
    %c0_27 = arith.constant 0 : index
    %c0_28 = arith.constant 0 : index
    %22 = vector.load %arg4[%c0_24, %c0_25, %c0_26, %c0_27, %c0_28] : memref<1x1x9x9x4xbf16, #tpu.memory_space<vmem>>, vector<1x1x8x8x4xbf16>
    %23 = vector.shape_cast %22 : vector<1x1x8x8x4xbf16> to vector<8x8x4xbf16>
    %24 = vector.shape_cast %23 : vector<8x8x4xbf16> to vector<64x4xbf16>
    %c3 = arith.constant 3 : index
    %c0_29 = arith.constant 0 : index
    %c0_30 = arith.constant 0 : index
    %25 = vector.load %arg6[%c3, %c0_29, %c0_30] : memref<9x4x4xbf16, #tpu.memory_space<vmem>>, vector<1x4x4xbf16>
    %26 = vector.shape_cast %25 : vector<1x4x4xbf16> to vector<4x4xbf16>
    %cst_31 = arith.constant dense<0.000000e+00> : vector<64x4xf32>
    %27 = tpu.matmul %24, %26, %cst_31 {dimension_numbers = #tpu.dot_dimension_numbers<[1], [0], [0], [1], [0, 0, 1, 1], [], []>} : vector<64x4xbf16>, vector<4x4xbf16>, vector<64x4xf32> -> vector<64x4xf32>
    %28 = arith.addf %21, %27 : vector<64x4xf32>
    %c0_32 = arith.constant 0 : index
    %c0_33 = arith.constant 0 : index
    %c0_34 = arith.constant 0 : index
    %c0_35 = arith.constant 0 : index
    %c0_36 = arith.constant 0 : index
    %29 = vector.load %arg5[%c0_32, %c0_33, %c0_34, %c0_35, %c0_36] : memref<1x1x9x9x4xbf16, #tpu.memory_space<vmem>>, vector<1x1x8x8x4xbf16>
    %30 = vector.shape_cast %29 : vector<1x1x8x8x4xbf16> to vector<8x8x4xbf16>
    %31 = vector.shape_cast %30 : vector<8x8x4xbf16> to vector<64x4xbf16>
    %c4 = arith.constant 4 : index
    %c0_37 = arith.constant 0 : index
    %c0_38 = arith.constant 0 : index
    %32 = vector.load %arg6[%c4, %c0_37, %c0_38] : memref<9x4x4xbf16, #tpu.memory_space<vmem>>, vector<1x4x4xbf16>
    %33 = vector.shape_cast %32 : vector<1x4x4xbf16> to vector<4x4xbf16>
    %cst_39 = arith.constant dense<0.000000e+00> : vector<64x4xf32>
    %34 = tpu.matmul %31, %33, %cst_39 {dimension_numbers = #tpu.dot_dimension_numbers<[1], [0], [0], [1], [0, 0, 1, 1], [], []>} : vector<64x4xbf16>, vector<4x4xbf16>, vector<64x4xf32> -> vector<64x4xf32>
    %35 = arith.addf %28, %34 : vector<64x4xf32>
    %c0_40 = arith.constant 0 : index
    %c0_41 = arith.constant 0 : index
    %c0_42 = arith.constant 0 : index
    %c1_43 = arith.constant 1 : index
    %c0_44 = arith.constant 0 : index
    %36 = vector.load %arg4[%c0_40, %c0_41, %c0_42, %c1_43, %c0_44] : memref<1x1x9x9x4xbf16, #tpu.memory_space<vmem>>, vector<1x1x8x8x4xbf16>
    %37 = vector.shape_cast %36 : vector<1x1x8x8x4xbf16> to vector<8x8x4xbf16>
    %38 = vector.shape_cast %37 : vector<8x8x4xbf16> to vector<64x4xbf16>
    %c5 = arith.constant 5 : index
    %c0_45 = arith.constant 0 : index
    %c0_46 = arith.constant 0 : index
    %39 = vector.load %arg6[%c5, %c0_45, %c0_46] : memref<9x4x4xbf16, #tpu.memory_space<vmem>>, vector<1x4x4xbf16>
    %40 = vector.shape_cast %39 : vector<1x4x4xbf16> to vector<4x4xbf16>
    %cst_47 = arith.constant dense<0.000000e+00> : vector<64x4xf32>
    %41 = tpu.matmul %38, %40, %cst_47 {dimension_numbers = #tpu.dot_dimension_numbers<[1], [0], [0], [1], [0, 0, 1, 1], [], []>} : vector<64x4xbf16>, vector<4x4xbf16>, vector<64x4xf32> -> vector<64x4xf32>
    %42 = arith.addf %35, %41 : vector<64x4xf32>
    %c0_48 = arith.constant 0 : index
    %c0_49 = arith.constant 0 : index
    %c1_50 = arith.constant 1 : index
    %c0_51 = arith.constant 0 : index
    %c0_52 = arith.constant 0 : index
    %43 = vector.load %arg2[%c0_48, %c0_49, %c1_50, %c0_51, %c0_52] : memref<1x1x9x9x4xbf16, #tpu.memory_space<vmem>>, vector<1x1x8x8x4xbf16>
    %44 = vector.shape_cast %43 : vector<1x1x8x8x4xbf16> to vector<8x8x4xbf16>
    %45 = vector.shape_cast %44 : vector<8x8x4xbf16> to vector<64x4xbf16>
    %c6 = arith.constant 6 : index
    %c0_53 = arith.constant 0 : index
    %c0_54 = arith.constant 0 : index
    %46 = vector.load %arg6[%c6, %c0_53, %c0_54] : memref<9x4x4xbf16, #tpu.memory_space<vmem>>, vector<1x4x4xbf16>
    %47 = vector.shape_cast %46 : vector<1x4x4xbf16> to vector<4x4xbf16>
    %cst_55 = arith.constant dense<0.000000e+00> : vector<64x4xf32>
    %48 = tpu.matmul %45, %47, %cst_55 {dimension_numbers = #tpu.dot_dimension_numbers<[1], [0], [0], [1], [0, 0, 1, 1], [], []>} : vector<64x4xbf16>, vector<4x4xbf16>, vector<64x4xf32> -> vector<64x4xf32>
    %49 = arith.addf %42, %48 : vector<64x4xf32>
    %c0_56 = arith.constant 0 : index
    %c0_57 = arith.constant 0 : index
    %c1_58 = arith.constant 1 : index
    %c0_59 = arith.constant 0 : index
    %c0_60 = arith.constant 0 : index
    %50 = vector.load %arg3[%c0_56, %c0_57, %c1_58, %c0_59, %c0_60] : memref<1x1x9x9x4xbf16, #tpu.memory_space<vmem>>, vector<1x1x8x8x4xbf16>
    %51 = vector.shape_cast %50 : vector<1x1x8x8x4xbf16> to vector<8x8x4xbf16>
    %52 = vector.shape_cast %51 : vector<8x8x4xbf16> to vector<64x4xbf16>
    %c7 = arith.constant 7 : index
    %c0_61 = arith.constant 0 : index
    %c0_62 = arith.constant 0 : index
    %53 = vector.load %arg6[%c7, %c0_61, %c0_62] : memref<9x4x4xbf16, #tpu.memory_space<vmem>>, vector<1x4x4xbf16>
    %54 = vector.shape_cast %53 : vector<1x4x4xbf16> to vector<4x4xbf16>
    %cst_63 = arith.constant dense<0.000000e+00> : vector<64x4xf32>
    %55 = tpu.matmul %52, %54, %cst_63 {dimension_numbers = #tpu.dot_dimension_numbers<[1], [0], [0], [1], [0, 0, 1, 1], [], []>} : vector<64x4xbf16>, vector<4x4xbf16>, vector<64x4xf32> -> vector<64x4xf32>
    %56 = arith.addf %49, %55 : vector<64x4xf32>
    %c0_64 = arith.constant 0 : index
    %c0_65 = arith.constant 0 : index
    %c1_66 = arith.constant 1 : index
    %c1_67 = arith.constant 1 : index
    %c0_68 = arith.constant 0 : index
    %57 = vector.load %arg2[%c0_64, %c0_65, %c1_66, %c1_67, %c0_68] : memref<1x1x9x9x4xbf16, #tpu.memory_space<vmem>>, vector<1x1x8x8x4xbf16>
    %58 = vector.shape_cast %57 : vector<1x1x8x8x4xbf16> to vector<8x8x4xbf16>
    %59 = vector.shape_cast %58 : vector<8x8x4xbf16> to vector<64x4xbf16>
    %c8 = arith.constant 8 : index
    %c0_69 = arith.constant 0 : index
    %c0_70 = arith.constant 0 : index
    %60 = vector.load %arg6[%c8, %c0_69, %c0_70] : memref<9x4x4xbf16, #tpu.memory_space<vmem>>, vector<1x4x4xbf16>
    %61 = vector.shape_cast %60 : vector<1x4x4xbf16> to vector<4x4xbf16>
    %cst_71 = arith.constant dense<0.000000e+00> : vector<64x4xf32>
    %62 = tpu.matmul %59, %61, %cst_71 {dimension_numbers = #tpu.dot_dimension_numbers<[1], [0], [0], [1], [0, 0, 1, 1], [], []>} : vector<64x4xbf16>, vector<4x4xbf16>, vector<64x4xf32> -> vector<64x4xf32>
    %63 = arith.addf %56, %62 : vector<64x4xf32>
    %64 = arith.truncf %63 : vector<64x4xf32> to vector<64x4xbf16>
    %c0_72 = arith.constant 0 : index
    %c0_73 = arith.constant 0 : index
    %c0_74 = arith.constant 0 : index
    %c0_75 = arith.constant 0 : index
    %65 = vector.load %arg7[%c0_72, %c0_73, %c0_74, %c0_75] : memref<1x1x64x4xbf16, #tpu.memory_space<vmem>>, vector<1x1x64x4xbf16>
    %66 = vector.shape_cast %65 : vector<1x1x64x4xbf16> to vector<64x4xbf16>
    %67 = vector.shape_cast %64 : vector<64x4xbf16> to vector<1x1x64x4xbf16>
    tpu.vector_store %arg7[%c0_72, %c0_73, %c0_74, %c0_75], %67 {strides = array<i32>} : memref<1x1x64x4xbf16, #tpu.memory_space<vmem>>, vector<1x1x64x4xbf16>,
    %cst_76 = arith.constant dense<0.000000e+00> : vector<4xf32>
    %68 = vector.multi_reduction <add>, %63, %cst_76 [0] : vector<64x4xf32> to vector<4xf32>
    %69 = vector.shape_cast %68 : vector<4xf32> to vector<1x4xf32>
    %c0_77 = arith.constant 0 : index
    %c0_78 = arith.constant 0 : index
    %c0_79 = arith.constant 0 : index
    %c0_80 = arith.constant 0 : index
    %70 = vector.load %arg8[%c0_77, %c0_78, %c0_79, %c0_80] : memref<1x1x1x4xf32, #tpu.memory_space<vmem>>, vector<1x1x1x4xf32>
    %71 = vector.shape_cast %70 : vector<1x1x1x4xf32> to vector<1x4xf32>
    %72 = vector.shape_cast %69 : vector<1x4xf32> to vector<1x1x1x4xf32>
    tpu.vector_store %arg8[%c0_77, %c0_78, %c0_79, %c0_80], %72 {strides = array<i32>} : memref<1x1x1x4xf32, #tpu.memory_space<vmem>>, vector<1x1x1x4xf32>,
    %73 = arith.mulf %63, %63 : vector<64x4xf32>
    %cst_81 = arith.constant dense<0.000000e+00> : vector<4xf32>
    %74 = vector.multi_reduction <add>, %73, %cst_81 [0] : vector<64x4xf32> to vector<4xf32>
    %75 = vector.shape_cast %74 : vector<4xf32> to vector<1x4xf32>
    %c0_82 = arith.constant 0 : index
    %c0_83 = arith.constant 0 : index
    %c0_84 = arith.constant 0 : index
    %c0_85 = arith.constant 0 : index
    %76 = vector.load %arg9[%c0_82, %c0_83, %c0_84, %c0_85] : memref<1x1x1x4xf32, #tpu.memory_space<vmem>>, vector<1x1x1x4xf32>
    %77 = vector.shape_cast %76 : vector<1x1x1x4xf32> to vector<1x4xf32>
    %78 = vector.shape_cast %75 : vector<1x4xf32> to vector<1x1x1x4xf32>
    tpu.vector_store %arg9[%c0_82, %c0_83, %c0_84, %c0_85], %78 {strides = array<i32>} : memref<1x1x1x4xf32, #tpu.memory_space<vmem>>, vector<1x1x1x4xf32>,
    return
  }
  func.func @transform_0(%arg0: i32, %arg1: i32) -> (i32, i32, i32, i32, i32) {
    %c0_i32 = arith.constant 0 : i32
    %c0_i32_0 = arith.constant 0 : i32
    %c0_i32_1 = arith.constant 0 : i32
    %c0_i32_2 = arith.constant 0 : i32
    return %arg0, %arg1, %c0_i32, %c0_i32_0, %c0_i32_1 : i32, i32, i32, i32, i32
  }
  func.func @transform_1(%arg0: i32, %arg1: i32) -> (i32, i32, i32, i32, i32) {
    %c0_i32 = arith.constant 0 : i32
    %c0_i32_0 = arith.constant 0 : i32
    %c0_i32_1 = arith.constant 0 : i32
    %c0_i32_2 = arith.constant 0 : i32
    return %arg0, %arg1, %c0_i32, %c0_i32_0, %c0_i32_1 : i32, i32, i32, i32, i32
  }
  func.func @transform_2(%arg0: i32, %arg1: i32) -> (i32, i32, i32, i32, i32) {
    %c0_i32 = arith.constant 0 : i32
    %c0_i32_0 = arith.constant 0 : i32
    %c0_i32_1 = arith.constant 0 : i32
    %c0_i32_2 = arith.constant 0 : i32
    return %arg0, %arg1, %c0_i32, %c0_i32_0, %c0_i32_1 : i32, i32, i32, i32, i32
  }
  func.func @transform_3(%arg0: i32, %arg1: i32) -> (i32, i32, i32, i32, i32) {
    %c0_i32 = arith.constant 0 : i32
    %c0_i32_0 = arith.constant 0 : i32
    %c0_i32_1 = arith.constant 0 : i32
    %c0_i32_2 = arith.constant 0 : i32
    return %arg0, %arg1, %c0_i32, %c0_i32_0, %c0_i32_1 : i32, i32, i32, i32, i32
  }
  func.func @transform_4(%arg0: i32, %arg1: i32) -> (i32, i32, i32) {
    %c0_i32 = arith.constant 0 : i32
    %c0_i32_0 = arith.constant 0 : i32
    %c0_i32_1 = arith.constant 0 : i32
    %c0_i32_2 = arith.constant 0 : i32
    return %c0_i32, %c0_i32_0, %c0_i32_1 : i32, i32, i32
  }
  func.func @transform_5(%arg0: i32, %arg1: i32) -> (i32, i32, i32, i32) {
    %c0_i32 = arith.constant 0 : i32
    %c0_i32_0 = arith.constant 0 : i32
    %c0_i32_1 = arith.constant 0 : i32
    return %arg0, %arg1, %c0_i32, %c0_i32_0 : i32, i32, i32, i32
  }
  func.func @transform_6(%arg0: i32, %arg1: i32) -> (i32, i32, i32, i32) {
    %c0_i32 = arith.constant 0 : i32
    %c0_i32_0 = arith.constant 0 : i32
    %c0_i32_1 = arith.constant 0 : i32
    return %arg0, %arg1, %c0_i32, %c0_i32_0 : i32, i32, i32, i32
  }
  func.func @transform_7(%arg0: i32, %arg1: i32) -> (i32, i32, i32, i32) {
    %c0_i32 = arith.constant 0 : i32
    %c0_i32_0 = arith.constant 0 : i32
    %c0_i32_1 = arith.constant 0 : i32
    return %arg0, %arg1, %c0_i32, %c0_i32_0 : i32, i32, i32, i32
  }
}

module attributes {stable_mosaic.version = 11 : i64} {
  func.func @_bn_lrelu_kernel(%arg0: i32, %arg1: i32, %arg2: memref<1x1x64x4xbf16, #tpu.memory_space<vmem>>, %arg3: memref<1x4xf32, #tpu.memory_space<vmem>>, %arg4: memref<1x4xf32, #tpu.memory_space<vmem>>, %arg5: memref<1x1x64x4xf32, #tpu.memory_space<vmem>>) attributes {dimension_semantics = [#tpu.dimension_semantics<parallel>, #tpu.dimension_semantics<parallel>], iteration_bounds = array<i64: 2, 1>, scalar_prefetch = 0 : i64, scratch_operands = 0 : i64, tpu.core_type = #tpu.core_type<tc>, window_params = [{transform_indices = @transform_0, window_bounds = array<i64: 1, 1, 64, 4>}, {pipeline_mode = #tpu.pipeline_mode<synchronous>, transform_indices = @transform_1, window_bounds = array<i64: 1, 4>}, {pipeline_mode = #tpu.pipeline_mode<synchronous>, transform_indices = @transform_2, window_bounds = array<i64: 1, 4>}, {transform_indices = @transform_3, window_bounds = array<i64: 1, 1, 64, 4>}]} {
    %c0 = arith.constant 0 : index
    %c0_0 = arith.constant 0 : index
    %c0_1 = arith.constant 0 : index
    %c0_2 = arith.constant 0 : index
    %0 = vector.load %arg2[%c0, %c0_0, %c0_1, %c0_2] : memref<1x1x64x4xbf16, #tpu.memory_space<vmem>>, vector<1x1x64x4xbf16>
    %1 = vector.shape_cast %0 : vector<1x1x64x4xbf16> to vector<64x4xbf16>
    %2 = arith.extf %1 : vector<64x4xbf16> to vector<64x4xf32>
    %c0_3 = arith.constant 0 : index
    %c0_4 = arith.constant 0 : index
    %3 = vector.load %arg3[%c0_3, %c0_4] : memref<1x4xf32, #tpu.memory_space<vmem>>, vector<1x4xf32>
    %4 = vector.broadcast %3 : vector<1x4xf32> to vector<64x4xf32>
    %5 = arith.mulf %2, %4 : vector<64x4xf32>
    %c0_5 = arith.constant 0 : index
    %c0_6 = arith.constant 0 : index
    %6 = vector.load %arg4[%c0_5, %c0_6] : memref<1x4xf32, #tpu.memory_space<vmem>>, vector<1x4xf32>
    %7 = vector.broadcast %6 : vector<1x4xf32> to vector<64x4xf32>
    %8 = arith.addf %5, %7 : vector<64x4xf32>
    %cst = arith.constant 0.000000e+00 : f32
    %9 = vector.broadcast %cst : f32 to vector<64x4xf32>
    %10 = arith.cmpf oge, %8, %9 : vector<64x4xf32>
    %cst_7 = arith.constant 0.00999999977 : f32
    %11 = vector.broadcast %cst_7 : f32 to vector<64x4xf32>
    %12 = arith.mulf %11, %8 : vector<64x4xf32>
    %13 = arith.select %10, %8, %12 : vector<64x4xi1>, vector<64x4xf32>
    %c0_8 = arith.constant 0 : index
    %c0_9 = arith.constant 0 : index
    %c0_10 = arith.constant 0 : index
    %c0_11 = arith.constant 0 : index
    %14 = vector.load %arg5[%c0_8, %c0_9, %c0_10, %c0_11] : memref<1x1x64x4xf32, #tpu.memory_space<vmem>>, vector<1x1x64x4xf32>
    %15 = vector.shape_cast %14 : vector<1x1x64x4xf32> to vector<64x4xf32>
    %16 = vector.shape_cast %13 : vector<64x4xf32> to vector<1x1x64x4xf32>
    tpu.vector_store %arg5[%c0_8, %c0_9, %c0_10, %c0_11], %16 {strides = array<i32>} : memref<1x1x64x4xf32, #tpu.memory_space<vmem>>, vector<1x1x64x4xf32>,
    return
  }
  func.func @transform_0(%arg0: i32, %arg1: i32) -> (i32, i32, i32, i32) {
    %c0_i32 = arith.constant 0 : i32
    %c0_i32_0 = arith.constant 0 : i32
    %c0_i32_1 = arith.constant 0 : i32
    return %arg0, %arg1, %c0_i32, %c0_i32_0 : i32, i32, i32, i32
  }
  func.func @transform_1(%arg0: i32, %arg1: i32) -> (i32, i32) {
    %c0_i32 = arith.constant 0 : i32
    %c0_i32_0 = arith.constant 0 : i32
    %c0_i32_1 = arith.constant 0 : i32
    return %c0_i32, %c0_i32_0 : i32, i32
  }
  func.func @transform_2(%arg0: i32, %arg1: i32) -> (i32, i32) {
    %c0_i32 = arith.constant 0 : i32
    %c0_i32_0 = arith.constant 0 : i32
    %c0_i32_1 = arith.constant 0 : i32
    return %c0_i32, %c0_i32_0 : i32, i32
  }
  func.func @transform_3(%arg0: i32, %arg1: i32) -> (i32, i32, i32, i32) {
    %c0_i32 = arith.constant 0 : i32
    %c0_i32_0 = arith.constant 0 : i32
    %c0_i32_1 = arith.constant 0 : i32
    return %arg0, %arg1, %c0_i32, %c0_i32_0 : i32, i32, i32, i32
  }
}

</mosaic_0001>

<bundles_post_ra>
// kernel: down_forward.3
= control target key start
LH: loop header
LB: loop body
LE: loop exit
PB: predicated region body
PF: predicated region fallthrough
CT: control target
= control target key end

     0   :  { %s480_s12 = smov 0   ;;  %s482_s13 = smov 0   ;;  %s541_s0 = inlined_call_operand.vmem [shape: bf16[2,1,64,4], index: 0, kind: input, shape index: {}]   ;;  %s542_s1 = inlined_call_operand.vmem [shape: f32[1,4], index: 1, kind: input, shape index: {}]   ;;  %s543_s2 = inlined_call_operand.vmem [shape: f32[1,4], index: 2, kind: input, shape index: {}]   ;;  %s544_s3 = inlined_call_operand.vmem [shape: f32[2,1,64,4], index: 3, kind: output, shape index: {}]  }
   0x1   :  { %s484_s14 = smov 0  }
   0x2 LB: > { %s25_s15 = sadd.s32 1, %s454_s13  ;;  %p382_p0 = scmp.ge.s32.totalorder %s458_s14, 1  ;;  %s458_s14 = sphi %s484_s14, %s13_s14   ;;  %s454_s13 = sphi %s482_s13, %s546_s13   ;;  %s450_s12 = sphi %s480_s12, %s545_s12  }
   0x3   : > { %p27_p1 = scmp.ge.s32.totalorder %s25_s15, 2  ;;  %p157_p2 = scmp.lt.s32.totalorder %s458_s14, 3 }
   0x5   : > { %s548_s15 = smov (%p27_p1, %s25_s15), 0  ;;  %p158_p3 = pnand %p382_p0, %p157_p2 }
   0x6   : > { %p189_p4 = scmp.lt.s32.totalorder (!%p158_p3), %s450_s12, 1  ;;  %v387_v0 = vld [vmem:[%s542_s1] ss:$0 sm:$0xff] (!%p158_p3)  ;;  %vm277_vm0 = vcmask (!%p158_p3), 31744  }
   0x7   : > { %161 = sbr.rel (%p158_p3) target bundleno = 33 (0x21), region = 32  ;;  %v388_v9 = vld [vmem:[%s543_s2] ss:$0 sm:$0xff] (!%p158_p3) }
   0xe   : > { %s550_s12 = smov (!%p189_p4, %s450_s12), 1 }
   0xf   : > { %s391_s16 = sshll.u32 %s550_s12, 5  ;;  %s392_s24 = sshll.u32 %s550_s12, 6 }
  0x10   : > { %s197_s19 = scalar_lea.vmem %s541_s0, %s391_s16  ;;  %s514_s27 = scalar_lea.vmem %s544_s3, %s392_s24 }
  0x11   : > { %v394_v1 = vld [vmem:[%s197_s19] sm:$0xff]   ;;  %v409_v2 = vld [vmem:[%s197_s19 + $0x8] sm:$0xff]   ;;  %v410_v3 = vld [vmem:[%s197_s19 + $0x10] sm:$0xff]  }
  0x12   : > { %v395_v4 = vunpack.c.l.bf16 %v394_v1  ;;  %v396_v5 = vunpack.c.h.bf16 %v394_v1  ;;  %v399_v6 = vunpack.c.l.bf16 %v409_v2  ;;  %v400_v7 = vunpack.c.h.bf16 %v409_v2  ;;  %v411_v8 = vld [vmem:[%s197_s19 + $0x18] sm:$0xff]  }
  0x13   : > { %v403_v10 = vunpack.c.l.bf16 %v410_v3  ;;  %v404_v11 = vunpack.c.h.bf16 %v410_v3  ;;  %v407_v12 = vunpack.c.l.bf16 %v411_v8  ;;  %v408_v13 = vunpack.c.h.bf16 %v411_v8 }
  0x14   : > { %v230_v14 = vmul.f32 %v395_v4, %v387_v0  ;;  %v231_v15 = vmul.f32 %v396_v5, %v387_v0  ;;  %v232_v16 = vmul.f32 %v399_v6, %v387_v0  ;;  %v233_v17 = vmul.f32 %v400_v7, %v387_v0 }
  0x15   : > { %v234_v18 = vmul.f32 %v403_v10, %v387_v0  ;;  %v235_v19 = vmul.f32 %v404_v11, %v387_v0  ;;  %v236_v20 = vmul.f32 %v407_v12, %v387_v0  ;;  %v237_v21 = vmul.f32 %v408_v13, %v387_v0 }
  0x16   : > { %v245_v22 = vadd.f32 %v388_v9, %v230_v14  ;;  %v246_v23 = vadd.f32 %v388_v9, %v231_v15  ;;  %v247_v24 = vadd.f32 %v388_v9, %v232_v16  ;;  %v248_v25 = vadd.f32 %v388_v9, %v233_v17 }
  0x17   : > { %v249_v26 = vadd.f32 %v388_v9, %v234_v18  ;;  %v250_v27 = vadd.f32 %v388_v9, %v235_v19  ;;  %v251_v28 = vadd.f32 %v388_v9, %v236_v20  ;;  %v252_v29 = vadd.f32 %v388_v9, %v237_v21 }
  0x18   : > { %vm253_vm1 = vcmp.ge.f32.partialorder %v245_v22, 0.0  ;;  %v261_v30 = vmul.f32 0.01, %v245_v22  ;;  %vm254_vm2 = vcmp.ge.f32.partialorder %v246_v23, 0.0  ;;  %v262_v31 = vmul.f32 0.01, %v246_v23 }
  0x19   : > { %vm255_vm3 = vcmp.ge.f32.partialorder %v247_v24, 0.0  ;;  %v263_v32 = vmul.f32 0.01, %v247_v24  ;;  %vm256_vm4 = vcmp.ge.f32.partialorder %v248_v25, 0.0  ;;  %v264_v33 = vmul.f32 0.01, %v248_v25 }
  0x1a   : > { %v269_v34 = vsel %vm253_vm1, %v245_v22, %v261_v30  ;;  %v270_v35 = vsel %vm254_vm2, %v246_v23, %v262_v31  ;;  %vm257_vm5 = vcmp.ge.f32.partialorder %v249_v26, 0.0  ;;  %v265_v36 = vmul.f32 0.01, %v249_v26 }
  0x1b   : > { %278 = vst.msk [vmem:[%s514_s27] sm:$0xff] %vm277_vm0, %v269_v34  ;;  %279 = vst.msk [vmem:[%s514_s27 + $0x8] sm:$0xff] %vm277_vm0, %v270_v35  ;;  %v271_v37 = vsel %vm255_vm3, %v247_v24, %v263_v32  ;;  %v272_v38 = vsel %vm256_vm4, %v248_v25, %v264_v33  ;;  %vm258_vm6 = vcmp.ge.f32.partialorder %v250_v27, 0.0  ;;  %v266_v39 = vmul.f32 0.01, %v250_v27 }
  0x1c   : > { %280 = vst.msk [vmem:[%s514_s27 + $0x10] sm:$0xff] %vm277_vm0, %v271_v37  ;;  %281 = vst.msk [vmem:[%s514_s27 + $0x18] sm:$0xff] %vm277_vm0, %v272_v38  ;;  %v273_v40 = vsel %vm257_vm5, %v249_v26, %v265_v36  ;;  %vm259_vm7 = vcmp.ge.f32.partialorder %v251_v28, 0.0  ;;  %v267_v41 = vmul.f32 0.01, %v251_v28  ;;  %vm260_vm8 = vcmp.ge.f32.partialorder %v252_v29, 0.0 }
  0x1d   : > { %282 = vst.msk [vmem:[%s514_s27 + $0x20] sm:$0xff] %vm277_vm0, %v273_v40  ;;  %v274_v42 = vsel %vm258_vm6, %v250_v27, %v266_v39  ;;  %v268_v43 = vmul.f32 0.01, %v252_v29 }
  0x1e   : > { %283 = vst.msk [vmem:[%s514_s27 + $0x28] sm:$0xff] %vm277_vm0, %v274_v42  ;;  %v275_v44 = vsel %vm259_vm7, %v251_v28, %v267_v41 }
  0x1f   : > { %284 = vst.msk [vmem:[%s514_s27 + $0x30] sm:$0xff] %vm277_vm0, %v275_v44  ;;  %v276_v45 = vsel %vm260_vm8, %v252_v29, %v268_v43 }
  0x20   : > { %285 = vst.msk [vmem:[%s514_s27 + $0x38] sm:$0xff] %vm277_vm0, %v276_v45 }
  0x21 PF: > { %s13_s14 = sadd.s32 1, %s458_s14   ;;  %s545_s12 = smov %s454_s13 }
  0x22   : > { %p10_p5 = scmp.ge.s32.totalorder %s13_s14, 4   ;;  %s546_s13 = smov %s548_s15 }
  0x24   :  { %12 = sbr.rel (!%p10_p5) target bundleno = 2 (0x2), region = 62 }

// kernel: down_forward.2
= control target key start
LH: loop header
LB: loop body
LE: loop exit
PB: predicated region body
PF: predicated region fallthrough
CT: control target
= control target key end

     0   :  { %s2624_s24 = smov 0   ;;  %s2626_s25 = smov 0   ;;  %s2961_s0 = inlined_call_operand.vmem [shape: bf16[2,1,9,9,4], index: 0, kind: input, shape index: {}]   ;;  %s2962_s1 = inlined_call_operand.vmem [shape: bf16[2,1,9,9,4], index: 1, kind: input, shape index: {}]   ;;  %s2963_s2 = inlined_call_operand.vmem [shape: bf16[2,1,9,9,4], index: 2, kind: input, shape index: {}]   ;;  %s2964_s3 = inlined_call_operand.vmem [shape: bf16[2,1,9,9,4], index: 3, kind: input, shape index: {}]   ;;  %s2965_s4 = inlined_call_operand.vmem [shape: bf16[9,4,4], index: 4, kind: input, shape index: {}]   ;;  %s2966_s5 = inlined_call_operand.vmem [shape: bf16[2,1,64,4], index: 5, kind: output, shape index: {0}]   ;;  %s2967_s6 = inlined_call_operand.vmem [shape: f32[2,1,1,4], index: 6, kind: output, shape index: {1}]   ;;  %s2968_s7 = inlined_call_operand.vmem [shape: f32[2,1,1,4], index: 7, kind: output, shape index: {2}]  }
   0x1   :  { %s2628_s26 = smov 0  }
   0x2 LB: > { %s30_s27 = sadd.s32 1, %s2578_s25  ;;  %p2162_p0 = scmp.ge.s32.totalorder %s2582_s26, 1  ;;  %s2582_s26 = sphi %s2628_s26, %s18_s26   ;;  %s2578_s25 = sphi %s2626_s25, %s2972_s25   ;;  %s2574_s24 = sphi %s2624_s24, %s2971_s24  }
   0x3   : > { %p32_p1 = scmp.ge.s32.totalorder %s30_s27, 2  ;;  %p314_p2 = scmp.lt.s32.totalorder %s2582_s26, 3 }
   0x5   : > { %s2974_s27 = smov (%p32_p1, %s30_s27), 0  ;;  %p315_p3 = pnand %p2162_p0, %p314_p2 }
   0x6   : > { %v2169_v0 = vld [vmem:[%s2965_s4 + $0x2] sm:$0x3] (!%p315_p3)  ;;  %vm503_vm0 = vcmask (!%p315_p3), 1041408   ;;  %v2648_v1 = vld [vmem:[%s2965_s4 + $0x8] sm:$0x3] (!%p315_p3)  ;;  %p393_p4 = scmp.lt.s32.totalorder (!%p315_p3), %s2574_s24, 1 }
   0x7   : > { %318 = sbr.rel (%p315_p3) target bundleno = 334 (0x14e), region = 40  ;;  %2501 = vmatprep.subr.msk.bf16.mxu1 (!%p315_p3), %vm503_vm0, %v2169_v0  ;;  %2505 = vmatprep.subr.msk.bf16.mxu0 (!%p315_p3), %vm503_vm0, %v2648_v1  ;;  %v505_v2 = vsel (!%p315_p3), %vm503_vm0, %v2169_v0, 0  ;;  %v2656_v3 = vsel (!%p315_p3), %vm503_vm0, %v2648_v1, 0  ;;  %v459_v4 = vld [vmem:[%s2965_s4] sm:$0x3] (!%p315_p3)  ;;  %vm490_vm1 = vcmask (!%p315_p3), 31744  }
   0x8   : > { %2346 = vmatpush3.bf16.msra.mxu1 (!%p315_p3), %v505_v2  ;;  %2386 = vmatpush3.bf16.msra.mxu0 (!%p315_p3), %v2656_v3  ;;  %v2213_v5 = vld [vmem:[%s2965_s4 + $0xa] sm:$0x3] (!%p315_p3)  ;;  %v605_v6 = vsel (!%p315_p3), %vm503_vm0, %v459_v4, 0  ;;  %v2230_v9 = vld [vmem:[%s2965_s4 + $0xc] sm:$0x3] (!%p315_p3)  ;;  %vm1871_vm5 = vcmask (!%p315_p3), 27648  }
   0x9   : > { %2502 = vmatprep.subr.msk.bf16.mxu1 (!%p315_p3), %vm503_vm0, %v459_v4  ;;  %2507 = vmatprep.subr.msk.bf16.mxu0 (!%p315_p3), %vm503_vm0, %v2213_v5  ;;  %v1296_v7 = vsel (!%p315_p3), %vm503_vm0, %v2213_v5, 0  ;;  %v2186_v10 = vld [vmem:[%s2965_s4 + $0x4] sm:$0x3] (!%p315_p3)  ;;  %vm688_vm2 = vsmask.f32 (!%p315_p3), 3328  ;;  %v2708_v15 = vsel (!%p315_p3), %vm503_vm0, %v2230_v9, 0 }
   0xa   : > { %vm689_vm3 = vsmask.f32 (!%p315_p3), 7440  ;;  %v2711_v16 = vsel (!%p315_p3), %vm503_vm0, %v2186_v10, 0  ;;  %vm1901_vm6 = vcmask (!%p315_p3), 24576  }
   0xb   : > { %vm2734_vm4 = vmor (!%p315_p3), %vm688_vm2, %vm689_vm3 }
   0xe   : > { %s2976_s24 = smov (!%p393_p4, %s2574_s24), 1 }
   0xf   : > { %s2670_s13 = smul.u32 72, %s2976_s24  ;;  %s443_s23 = scalar_lea.vmem %s2967_s6, %s2976_s24 }
  0x11   : > { %s2676_s16 = scalar_lea.vmem %s2962_s1, %s2670_s13  ;;  %s2685_s19 = scalar_lea.vmem %s2964_s3, %s2670_s13 }
  0x12   : > { %v2536_v8 = vld [vmem:[%s2676_s16] ss:$8 sps:$4 sm:$0xff]   ;;  %v2538_v12 = vld [vmem:[%s2676_s16 + $0x10] ss:$8 sps:$4 sm:$0xff]   ;;  %s2700_s30 = scalar_lea.vmem %s2963_s2, %s2670_s13  ;;  %s2728_s10 = scalar_lea.vmem %s2961_s0, %s2670_s13 }
  0x13   : > { %v2537_v11 = vld [vmem:[%s2685_s19] ss:$8 sps:$4 sm:$0xff]   ;;  %2347 = vmatprep.mubr.msk.bf16.mxu1 %vm490_vm1, %v2536_v8  ;;  %v2539_v13 = vld [vmem:[%s2685_s19 + $0x10] ss:$8 sps:$4 sm:$0xff]   ;;  %v1142_v19 = vld [vmem:[%s2700_s30 + $0x4] sm:$0x1] }
  0x14   : > { %2387 = vmatprep.mubr.msk.bf16.mxu0 %vm490_vm1, %v2537_v11  ;;  %2348 = vmatmul.mubr.msk.bf16.vlgmr.msra.gmra.mrb[0].mxu1 %vm490_vm1, %v2538_v12  ;;  %v2540_v14 = vld [vmem:[%s2676_s16 + $0x20] ss:$8 sps:$4 sm:$0xff]   ;;  %v2541_v17 = vld [vmem:[%s2676_s16 + $0x30] ss:$8 sps:$4 sm:$0xff]   ;;  %v1144_v21 = vld [vmem:[%s2700_s30 + $0xc] sm:$0x1] }
  0x15   : > { %2356 = vmatpush3.bf16.msra.mxu1 %v605_v6  ;;  %2388 = vmatmul.mubr.msk.bf16.vlgmr.msra.gmra.mrb[0].mxu0 %vm490_vm1, %v2539_v13  ;;  %v1141_v18 = vld [vmem:[%s2700_s30] sm:$0xf]  ;;  %v1143_v20 = vld [vmem:[%s2700_s30 + $0x8] sm:$0xf]  ;;  %v1167_v24 = vshll.u32 %v1142_v19, 16  ;;  %v1181_v27 = vshll.u32 %v1144_v21, 16 }
  0x16   : > { %2396 = vmatpush3.bf16.msra.mxu0 %v1296_v7  ;;  %2351 = vmatprep.mubr.msk.bf16.mxu1 %vm490_vm1, %v2540_v14  ;;  %v1158_v22 = vshrl.u32 %v1141_v18, 16  ;;  %v1161_v23 = vshll.u32 %v1141_v18, 16  ;;  %v1172_v25 = vshrl.u32 %v1143_v20, 16  ;;  %v1175_v26 = vshll.u32 %v1143_v20, 16  ;;  %v1145_v28 = vld [vmem:[%s2700_s30 + $0x10] sm:$0xf] }
  0x17   : > { %2508 = vmatprep.subr.msk.bf16.mxu0 %vm503_vm0, %v2230_v9  ;;  %2503 = vmatprep.subr.msk.bf16.mxu1 %vm503_vm0, %v2186_v10  ;;  %v1146_v29 = vld [vmem:[%s2700_s30 + $0x14] sm:$0x1]  ;;  %v1169_v32 = vrot.slane %v1167_v24, 5  ;;  %v1147_v34 = vld [vmem:[%s2700_s30 + $0x18] sm:$0xf]  ;;  %v1183_v36 = vrot.slane %v1181_v27, 5 }
  0x18   : > { %v1160_v30 = vrot.slane %v1158_v22, 4  ;;  %v1163_v31 = vrot.slane %v1161_v23, 5  ;;  %v1174_v33 = vrot.slane %v1172_v25, 4  ;;  %v1177_v35 = vrot.slane %v1175_v26, 5  ;;  %v1148_v37 = vld [vmem:[%s2700_s30 + $0x1c] sm:$0x1] }
  0x19   : > { %v1186_v38 = vshrl.u32 %v1145_v28, 16  ;;  %v1189_v39 = vshll.u32 %v1145_v28, 16  ;;  %v1195_v41 = vshll.u32 %v1146_v29, 16  ;;  %v1200_v42 = vshrl.u32 %v1147_v34, 16  ;;  %v2542_v53 = vld [vmem:[%s2728_s10] ss:$8 sps:$4 sm:$0xff]  }
  0x1a   : > { %v1164_v40 = vor.u32 %v1163_v31, %v1160_v30  ;;  %v1203_v43 = vshll.u32 %v1147_v34, 16  ;;  %v1178_v45 = vor.u32 %v1177_v35, %v1174_v33  ;;  %v1209_v48 = vshll.u32 %v1148_v37, 16  ;;  %v2543_v59 = vld [vmem:[%s2728_s10 + $0x10] ss:$8 sps:$4 sm:$0xff]   ;;  %v1149_v60 = vld [vmem:[%s2700_s30 + $0x20] sm:$0xf] }
  0x1b   : > { %v1188_v46 = vrot.slane %v1186_v38, 4  ;;  %v1191_v47 = vrot.slane %v1189_v39, 5  ;;  %v1197_v50 = vrot.slane %v1195_v41, 5  ;;  %v1202_v51 = vrot.slane %v1200_v42, 4  ;;  %v1150_v61 = vld [vmem:[%s2700_s30 + $0x24] sm:$0x1] }
  0x1c   : > { %2352 = vmatmul.mubr.msk.bf16.gmra.mrb[4].mxu1 %vm490_vm1, %v2541_v17  ;;  %v1165_v49 = vrot.slane %v1164_v40, 4  ;;  %v1205_v52 = vrot.slane %v1203_v43, 5  ;;  %v1179_v54 = vrot.slane %v1178_v45, 4  ;;  %v1211_v56 = vrot.slane %v1209_v48, 5  ;;  %v1151_v0 = vld [vmem:[%s2700_s30 + $0x28] sm:$0xf] }
  0x1d   : > { %v1192_v55 = vor.u32 %v1191_v47, %v1188_v46  ;;  %2357 = vmatprep.mubr.msk.bf16.mxu1 %vm490_vm1, %v2542_v53  ;;  %v1152_v2 = vld [vmem:[%s2700_s30 + $0x2c] sm:$0x1]  ;;  %v1214_v4 = vshrl.u32 %v1149_v60, 16  ;;  %v1217_v7 = vshll.u32 %v1149_v60, 16  ;;  %v1223_v8 = vshll.u32 %v1150_v61, 16 }
  0x1e   : > { %v1170_v57 = vsel %vm2734_vm4, %v1165_v49, %v1169_v32  ;;  %v1206_v58 = vor.u32 %v1205_v52, %v1202_v51  ;;  %v1184_v62 = vsel %vm2734_vm4, %v1179_v54, %v1183_v36  ;;  %v1153_v9 = vld [vmem:[%s2700_s30 + $0x30] sm:$0xf]  ;;  %v2753_v10 = vld [vmem:[%s2965_s4 + $0x6] sm:$0x3]  ;;  %v1228_v13 = vshrl.u32 %v1151_v0, 16 }
  0x1f   : > { %v1193_v63 = vrot.slane %v1192_v55, 4  ;;  %v2214_v5 = vcombine.low %v1170_v57, %v1184_v62  ;;  %v1216_v12 = vrot.slane %v1214_v4, 4  ;;  %v1231_v14 = vshll.u32 %v1151_v0, 16  ;;  %v1154_v17 = vld [vmem:[%s2700_s30 + $0x34] sm:$0x1] }
  0x20   : > { %v1207_v6 = vrot.slane %v1206_v58, 4  ;;  %v1219_v19 = vrot.slane %v1217_v7, 5  ;;  %v1225_v20 = vrot.slane %v1223_v8, 5  ;;  %v1237_v21 = vshll.u32 %v1152_v2, 16  ;;  %v1155_v22 = vld [vmem:[%s2700_s30 + $0x38] sm:$0xf] }
  0x21   : > { %v1198_v11 = vsel %vm2734_vm4, %v1193_v63, %v1197_v50  ;;  %2397 = vmatprep.mubr.msk.bf16.mxu0 %vm490_vm1, %v2214_v5  ;;  %v2765_v23 = vld [vmem:[%s2965_s4 + $0xe] sm:$0x3]  ;;  %v1230_v25 = vrot.slane %v1228_v13, 4  ;;  %v1233_v26 = vrot.slane %v1231_v14, 5  ;;  %v1156_v27 = vld [vmem:[%s2700_s30 + $0x3c] sm:$0x1] }
  0x22   : > { %v1212_v18 = vsel %vm2734_vm4, %v1207_v6, %v1211_v56  ;;  %v1242_v28 = vshrl.u32 %v1153_v9, 16  ;;  %v1220_v29 = vor.u32 %v1219_v19, %v1216_v12  ;;  %v1239_v30 = vrot.slane %v1237_v21, 5  ;;  %v2546_v53 = vld [vmem:[%s2728_s10 + $0x8] ss:$8 sps:$4 sm:$0xff]   ;;  %v672_v54 = vld [vmem:[%s2728_s10] sm:$0xf] }
  0x23   : > { %v2215_v24 = vcombine.low %v1198_v11, %v1212_v18  ;;  %v1245_v31 = vshll.u32 %v1153_v9, 16  ;;  %v1251_v32 = vshll.u32 %v1154_v17, 16  ;;  %v1234_v33 = vor.u32 %v1233_v26, %v1230_v25  ;;  %v673_v56 = vld [vmem:[%s2728_s10 + $0x4] sm:$0x1]  ;;  %v674_v57 = vld [vmem:[%s2728_s10 + $0x8] sm:$0xf] }
  0x24   : > { %2358 = vmatmul.mubr.msk.bf16.vlgmr.msra.gmra.mrb[0].mxu1 %vm490_vm1, %v2543_v59  ;;  %v1244_v34 = vrot.slane %v1242_v28, 4  ;;  %v1256_v35 = vshrl.u32 %v1155_v22, 16  ;;  %v1259_v36 = vshll.u32 %v1155_v22, 16  ;;  %v1221_v37 = vrot.slane %v1220_v29, 4  ;;  %v675_v58 = vld [vmem:[%s2728_s10 + $0xc] sm:$0x1] }
  0x25   : > { %2366 = vmatpush3.bf16.msra.mxu1 %v2711_v16  ;;  %2398 = vmatmul.mubr.msk.bf16.vlgmr.msra.gmra.mrb[0].mxu0 %vm490_vm1, %v2215_v24  ;;  %v1247_v38 = vrot.slane %v1245_v31, 5  ;;  %v1265_v39 = vshll.u32 %v1156_v27, 16  ;;  %v2544_v16 = vld [vmem:[%s2728_s10 + $0x20] ss:$8 sps:$4 sm:$0xff]   ;;  %v1235_v40 = vrot.slane %v1234_v33, 4  ;;  %v1253_v46 = vrot.slane %v1251_v32, 5 }
  0x26   : > { %2504 = vmatprep.subr.msk.bf16.mxu1 %vm503_vm0, %v2753_v10  ;;  %2406 = vmatpush3.bf16.msra.mxu0 %v2708_v15  ;;  %v1258_v41 = vrot.slane %v1256_v35, 4  ;;  %v1261_v42 = vrot.slane %v1259_v36, 5  ;;  %v1226_v43 = vsel %vm2734_vm4, %v1221_v37, %v1225_v20  ;;  %v2545_v15 = vld [vmem:[%s2728_s10 + $0x30] ss:$8 sps:$4 sm:$0xff]   ;;  %v692_v60 = vshrl.u32 %v672_v54, 16 }
  0x27   : > { %2509 = vmatprep.subr.msk.bf16.mxu0 %vm503_vm0, %v2765_v23  ;;  %v1248_v45 = vor.u32 %v1247_v38, %v1244_v34  ;;  %2361 = vmatprep.mubr.msk.bf16.mxu1 %vm490_vm1, %v2544_v16  ;;  %v1240_v47 = vsel %vm2734_vm4, %v1235_v40, %v1239_v30  ;;  %v1267_v49 = vrot.slane %v1265_v39, 5  ;;  %v695_v61 = vshll.u32 %v672_v54, 16  ;;  %v676_v63 = vld [vmem:[%s2728_s10 + $0x10] sm:$0xf]  ;;  %v677_v6 = vld [vmem:[%s2728_s10 + $0x14] sm:$0x1] }
  0x28   : > { %v1262_v48 = vor.u32 %v1261_v42, %v1258_v41  ;;  %v2216_v50 = vcombine.low %v1226_v43, %v1240_v47  ;;  %v701_v62 = vshll.u32 %v673_v56, 16  ;;  %v706_v2 = vshrl.u32 %v674_v57, 16  ;;  %v678_v11 = vld [vmem:[%s2728_s10 + $0x18] sm:$0xf]  ;;  %v679_v18 = vld [vmem:[%s2728_s10 + $0x1c] sm:$0x1] }
  0x29   : > { %v1249_v51 = vrot.slane %v1248_v45, 4  ;;  %v709_v4 = vshll.u32 %v674_v57, 16  ;;  %v715_v5 = vshll.u32 %v675_v58, 16  ;;  %v694_v7 = vrot.slane %v692_v60, 4  ;;  %v2547_v29 = vld [vmem:[%s2728_s10 + $0x18] ss:$8 sps:$4 sm:$0xff]  }
  0x2a   : > { %v1263_v52 = vrot.slane %v1262_v48, 4  ;;  %2401 = vmatprep.mubr.msk.bf16.mxu0 %vm490_vm1, %v2216_v50  ;;  %v697_v8 = vrot.slane %v695_v61, 5  ;;  %v703_v9 = vrot.slane %v701_v62, 5  ;;  %v720_v12 = vshrl.u32 %v676_v63, 16  ;;  %v2548_v37 = vld [vmem:[%s2728_s10 + $0x28] ss:$8 sps:$4 sm:$0xff]  }
  0x2b   : > { %v1254_v55 = vsel %vm2734_vm4, %v1249_v51, %v1253_v46  ;;  %v708_v13 = vrot.slane %v706_v2, 4  ;;  %v711_v14 = vrot.slane %v709_v4, 5  ;;  %v717_v17 = vrot.slane %v715_v5, 5  ;;  %v680_v40 = vld [vmem:[%s2728_s10 + $0x20] sm:$0xf] }
  0x2c   : > { %2362 = vmatmul.mubr.msk.bf16.gmra.mrb[4].mxu1 %vm490_vm1, %v2545_v15  ;;  %v1268_v59 = vsel %vm2734_vm4, %v1263_v52, %v1267_v49  ;;  %v723_v19 = vshll.u32 %v676_v63, 16  ;;  %v698_v20 = vor.u32 %v697_v8, %v694_v7  ;;  %v722_v21 = vrot.slane %v720_v12, 4  ;;  %v681_v45 = vld [vmem:[%s2728_s10 + $0x24] sm:$0x1]  ;;  %v682_v46 = vld [vmem:[%s2728_s10 + $0x28] sm:$0xf] }
  0x2d   : > { %v2217_v0 = vcombine.low %v1254_v55, %v1268_v59  ;;  %v729_v22 = vshll.u32 %v677_v6, 16  ;;  %v734_v24 = vshrl.u32 %v678_v11, 16  ;;  %v712_v25 = vor.u32 %v711_v14, %v708_v13  ;;  %v683_v48 = vld [vmem:[%s2728_s10 + $0x2c] sm:$0x1]  ;;  %v684_v55 = vld [vmem:[%s2728_s10 + $0x30] sm:$0xf] }
  0x2e   : > { %v725_v26 = vrot.slane %v723_v19, 5  ;;  %v737_v27 = vshll.u32 %v678_v11, 16  ;;  %v743_v28 = vshll.u32 %v679_v18, 16  ;;  %v1534_v30 = vsel %vm503_vm0, %v2765_v23, 0  ;;  %v2812_v23 = vld [vmem:[%s2965_s4 + $0x10] sm:$0x3] }
  0x2f   : > { %2402 = vmatmul.mubr.msk.bf16.gmra.mrb[4].mxu0 %vm490_vm1, %v2217_v0  ;;  %v699_v31 = vrot.slane %v698_v20, 4  ;;  %v731_v32 = vrot.slane %v729_v22, 5  ;;  %v736_v33 = vrot.slane %v734_v24, 4  ;;  %v713_v34 = vrot.slane %v712_v25, 4  ;;  %v685_v60 = vld [vmem:[%s2728_s10 + $0x34] sm:$0x1] }
  0x30   : > { %2407 = vmatprep.mubr.msk.bf16.mxu0 %vm490_vm1, %v2546_v53  ;;  %v726_v35 = vor.u32 %v725_v26, %v722_v21  ;;  %v739_v36 = vrot.slane %v737_v27, 5  ;;  %v745_v39 = vrot.slane %v743_v28, 5  ;;  %v948_v16 = vsel %vm503_vm0, %v2753_v10, 0  ;;  %v2549_v62 = vld [vmem:[%s2728_s10 + $0x38] ss:$8 sps:$4 sm:$0xff]  }
  0x31   : > { %v704_v38 = vsel %vm2734_vm4, %v699_v31, %v703_v9  ;;  %v718_v41 = vsel %vm2734_vm4, %v713_v34, %v717_v17  ;;  %v748_v15 = vshrl.u32 %v680_v40, 16  ;;  %v751_v49 = vshll.u32 %v680_v40, 16  ;;  %v686_v0 = vld [vmem:[%s2728_s10 + $0x38] sm:$0xf]  ;;  %v687_v2 = vld [vmem:[%s2728_s10 + $0x3c] sm:$0x1] }
  0x32   : > { %v727_v42 = vrot.slane %v726_v35, 4  ;;  %v740_v43 = vor.u32 %v739_v36, %v736_v33  ;;  %v2187_v47 = vcombine.low %v704_v38, %v718_v41  ;;  %v757_v10 = vshll.u32 %v681_v45, 16  ;;  %v2550_v14 = vld [vmem:[%s2676_s16 + $0x8] ss:$8 sps:$4 sm:$0xff]   ;;  %v2551_v35 = vld [vmem:[%s2676_s16 + $0x18] ss:$8 sps:$4 sm:$0xff]  }
  0x33   : > { %v762_v50 = vshrl.u32 %v682_v46, 16  ;;  %v750_v53 = vrot.slane %v748_v15, 4  ;;  %v765_v54 = vshll.u32 %v682_v46, 16  ;;  %v753_v56 = vrot.slane %v751_v49, 5  ;;  %v2257_v40 = vld [vmem:[%s2728_s10 + $0xc] sm:$0x1] }
  0x34   : > { %v732_v51 = vsel %vm2734_vm4, %v727_v42, %v731_v32  ;;  %v741_v52 = vrot.slane %v740_v43, 4  ;;  %2367 = vmatprep.mubr.msk.bf16.mxu1 %vm490_vm1, %v2187_v47  ;;  %v759_v57 = vrot.slane %v757_v10, 5  ;;  %v771_v59 = vshll.u32 %v683_v48, 16  ;;  %v2258_v41 = vld [vmem:[%s2728_s10 + $0x10] sm:$0xf] }
  0x35   : > { %v764_v58 = vrot.slane %v762_v50, 4  ;;  %v767_v63 = vrot.slane %v765_v54, 5  ;;  %v776_v4 = vshrl.u32 %v684_v55, 16  ;;  %v754_v6 = vor.u32 %v753_v56, %v750_v53  ;;  %v2259_v42 = vld [vmem:[%s2728_s10 + $0x14] sm:$0x1] }
  0x36   : > { %v746_v61 = vsel %vm2734_vm4, %v741_v52, %v745_v39  ;;  %v773_v7 = vrot.slane %v771_v59, 5  ;;  %v779_v8 = vshll.u32 %v684_v55, 16  ;;  %v785_v12 = vshll.u32 %v685_v60, 16  ;;  %v2554_v39 = vld [vmem:[%s2676_s16 + $0x28] ss:$8 sps:$4 sm:$0xff]  }
  0x37   : > { %2408 = vmatmul.mubr.msk.bf16.vlgmr.msra.gmra.mrb[0].mxu0 %vm490_vm1, %v2547_v29  ;;  %v2188_v5 = vcombine.low %v732_v51, %v746_v61  ;;  %v768_v9 = vor.u32 %v767_v63, %v764_v58  ;;  %v778_v11 = vrot.slane %v776_v4, 4  ;;  %v790_v13 = vshrl.u32 %v686_v0, 16  ;;  %v2260_v48 = vld [vmem:[%s2728_s10 + $0x18] sm:$0xf]  ;;  %v2261_v50 = vld [vmem:[%s2728_s10 + $0x1c] sm:$0x1] }
  0x38   : > { %2416 = vmatpush3.bf16.msra.mxu0 %v1534_v30  ;;  %2411 = vmatprep.mubr.msk.bf16.mxu0 %vm490_vm1, %v2548_v37  ;;  %v755_v17 = vrot.slane %v754_v6, 4  ;;  %v781_v18 = vrot.slane %v779_v8, 5  ;;  %v793_v19 = vshll.u32 %v686_v0, 16  ;;  %v799_v20 = vshll.u32 %v687_v2, 16  ;;  %v2552_v37 = vld [vmem:[%s2700_s30] ss:$8 sps:$4 sm:$0xff]  }
  0x39   : > { %2510 = vmatprep.subr.msk.bf16.mxu0 %vm503_vm0, %v2812_v23  ;;  %2368 = vmatmul.mubr.msk.bf16.vlgmr.msra.gmra.mrb[0].mxu1 %vm490_vm1, %v2188_v5  ;;  %v769_v21 = vrot.slane %v768_v9, 4  ;;  %v792_v22 = vrot.slane %v790_v13, 4  ;;  %v787_v26 = vrot.slane %v785_v12, 5  ;;  %v1764_v34 = vsel %vm503_vm0, %v2812_v23, 0  ;;  %v2262_v51 = vld [vmem:[%s2728_s10 + $0x20] sm:$0xf] }
  0x3a   : > { %2376 = vmatpush3.bf16.msra.mxu1 %v948_v16  ;;  %v760_v24 = vsel %vm2734_vm4, %v755_v17, %v759_v57  ;;  %v782_v25 = vor.u32 %v781_v18, %v778_v11  ;;  %v795_v27 = vrot.slane %v793_v19, 5  ;;  %v801_v32 = vrot.slane %v799_v20, 5  ;;  %v2256_v16 = vld [vmem:[%s2728_s10 + $0x8] sm:$0xf]  ;;  %v2553_v52 = vld [vmem:[%s2700_s30 + $0x10] ss:$8 sps:$4 sm:$0xff]  }
  0x3b   : > { %2506 = vmatprep.subr.msk.bf16.mxu1 %vm503_vm0, %v2648_v1  ;;  %v774_v28 = vsel %vm2734_vm4, %v769_v21, %v773_v7  ;;  %v1626_v43 = vshrl.u32 %v2256_v16, 16  ;;  %v1629_v45 = vshll.u32 %v2256_v16, 16  ;;  %v1635_v23 = vshll.u32 %v2257_v40, 16  ;;  %v2555_v53 = vld [vmem:[%s2676_s16 + $0x38] ss:$8 sps:$4 sm:$0xff]   ;;  %s2291_s16 = sshll.u32 %s2976_s24, 5 }
  0x3c   : > { %v2189_v29 = vcombine.low %v760_v24, %v774_v28  ;;  %v783_v30 = vrot.slane %v782_v25, 4  ;;  %v796_v31 = vor.u32 %v795_v27, %v792_v22  ;;  %v1640_v46 = vshrl.u32 %v2258_v41, 16  ;;  %v2263_v58 = vld [vmem:[%s2728_s10 + $0x24] sm:$0x1]  ;;  %v2556_v5 = vld [vmem:[%s2700_s30 + $0x20] ss:$8 sps:$4 sm:$0xff]   ;;  %s2910_s21 = scalar_lea.vmem %s2966_s5, %s2291_s16 }
  0x3d   : > { %v1643_v15 = vshll.u32 %v2258_v41, 16  ;;  %v1649_v47 = vshll.u32 %v2259_v42, 16  ;;  %v1628_v49 = vrot.slane %v1626_v43, 4  ;;  %v1631_v10 = vrot.slane %v1629_v45, 5  ;;  %v2264_v17 = vld [vmem:[%s2728_s10 + $0x28] sm:$0xf] }
  0x3e   : > { %2371 = vmatprep.mubr.msk.bf16.mxu1 %vm490_vm1, %v2189_v29  ;;  %v788_v1 = vsel %vm2734_vm4, %v783_v30, %v787_v26  ;;  %v797_v33 = vrot.slane %v796_v31, 4  ;;  %v1637_v54 = vrot.slane %v1635_v23, 5  ;;  %v1642_v55 = vrot.slane %v1640_v46, 4  ;;  %v2265_v20 = vld [vmem:[%s2728_s10 + $0x2c] sm:$0x1] }
  0x3f   : > { %2412 = vmatmul.mubr.msk.bf16.gmra.mrb[4].mxu0 %vm490_vm1, %v2549_v62  ;;  %v1645_v56 = vrot.slane %v1643_v15, 5  ;;  %v1651_v57 = vrot.slane %v1649_v47, 5  ;;  %v1632_v59 = vor.u32 %v1631_v10, %v1628_v49  ;;  %v1654_v60 = vshrl.u32 %v2260_v48, 16  ;;  %v2266_v21 = vld [vmem:[%s2728_s10 + $0x30] sm:$0xf] }
  0x40   : > { %2417 = vmatprep.mubr.msk.bf16.mxu0 %vm490_vm1, %v2550_v14  ;;  %v802_v36 = vsel %vm2734_vm4, %v797_v33, %v801_v32  ;;  %v1657_v61 = vshll.u32 %v2260_v48, 16  ;;  %v1663_v62 = vshll.u32 %v2261_v50, 16  ;;  %v1668_v0 = vshrl.u32 %v2262_v51, 16  ;;  %v2267_v22 = vld [vmem:[%s2728_s10 + $0x34] sm:$0x1] }
  0x41   : > { %v2190_v38 = vcombine.low %v788_v1, %v802_v36  ;;  %v1646_v63 = vor.u32 %v1645_v56, %v1642_v55  ;;  %v1671_v2 = vshll.u32 %v2262_v51, 16  ;;  %v1677_v4 = vshll.u32 %v2263_v58, 16  ;;  %v2557_v32 = vld [vmem:[%s2700_s30 + $0x30] ss:$8 sps:$4 sm:$0xff]   ;;  %v2269_v16 = vld [vmem:[%s2728_s10 + $0x3c] sm:$0x1]  ;;  %s449_s30 = scalar_lea.vmem %s2968_s7, %s2976_s24 }
  0x42   : > { %v1633_v6 = vrot.slane %v1632_v59, 4  ;;  %v1656_v7 = vrot.slane %v1654_v60, 4  ;;  %v1659_v8 = vrot.slane %v1657_v61, 5  ;;  %v1665_v9 = vrot.slane %v1663_v62, 5  ;;  %v2268_v36 = vld [vmem:[%s2728_s10 + $0x38] sm:$0xf] }
  0x43   : > { %2372 = vmatmul.mubr.msk.bf16.gmra.mrb[4].mxu1 %vm490_vm1, %v2190_v38  ;;  %v1647_v11 = vrot.slane %v1646_v63, 4  ;;  %v1670_v12 = vrot.slane %v1668_v0, 4  ;;  %v1673_v13 = vrot.slane %v1671_v2, 5  ;;  %v1679_v14 = vrot.slane %v1677_v4, 5  ;;  %v2270_v43 = vld [vmem:[%s2728_s10 + $0x40] sm:$0xf] }
  0x44   : > { %2377 = vmatprep.mubr.msk.bf16.mxu1 %vm490_vm1, %v2552_v37  ;;  %v1638_v18 = vsel %vm2734_vm4, %v1633_v6, %v1637_v54  ;;  %v1660_v19 = vor.u32 %v1659_v8, %v1656_v7  ;;  %v1682_v26 = vshrl.u32 %v2264_v17, 16  ;;  %v1685_v27 = vshll.u32 %v2264_v17, 16  ;;  %v2271_v45 = vld [vmem:[%s2728_s10 + $0x44] sm:$0x1]  ;;  %v2558_v15 = vld [vmem:[%s2685_s19 + $0x20] ss:$8 sps:$4 sm:$0xff]  }
  0x45   : > { %v1652_v24 = vsel %vm2734_vm4, %v1647_v11, %v1651_v57  ;;  %v1674_v25 = vor.u32 %v1673_v13, %v1670_v12  ;;  %v1691_v30 = vshll.u32 %v2265_v20, 16  ;;  %v1696_v31 = vshrl.u32 %v2266_v21, 16  ;;  %v2559_v8 = vld [vmem:[%s2685_s19 + $0x30] ss:$8 sps:$4 sm:$0xff]  }
  0x46   : > { %v2273_v28 = vcombine.low %v1638_v18, %v1652_v24  ;;  %v1661_v29 = vrot.slane %v1660_v19, 4  ;;  %v1684_v33 = vrot.slane %v1682_v26, 4  ;;  %v1710_v23 = vshrl.u32 %v2268_v36, 16 }
  0x47   : > { %2418 = vmatmul.mubr.msk.bf16.vlgmr.msra.gmra.mrb[0].mxu0 %vm490_vm1, %v2551_v35  ;;  %v1675_v1 = vrot.slane %v1674_v25, 4  ;;  %v1699_v35 = vshll.u32 %v2266_v21, 16  ;;  %v1693_v37 = vrot.slane %v1691_v30, 5  ;;  %v1698_v38 = vrot.slane %v1696_v31, 4 }
  0x48   : > { %2426 = vmatpush3.bf16.msra.mxu0 %v1764_v34  ;;  %2421 = vmatprep.mubr.msk.bf16.mxu0 %vm490_vm1, %v2554_v39  ;;  %v1687_v34 = vrot.slane %v1685_v27, 5  ;;  %v1705_v39 = vshll.u32 %v2267_v22, 16  ;;  %v1713_v48 = vshll.u32 %v2268_v36, 16  ;;  %v1719_v49 = vshll.u32 %v2269_v16, 16 }
  0x49   : > { %v1680_v40 = vsel %vm2734_vm4, %v1675_v1, %v1679_v14  ;;  %v1701_v42 = vrot.slane %v1699_v35, 5  ;;  %v1712_v51 = vrot.slane %v1710_v23, 4  ;;  %v1727_v54 = vshll.u32 %v2270_v43, 16 }
  0x4a   : > { %v1688_v41 = vor.u32 %v1687_v34, %v1684_v33  ;;  %v1707_v47 = vrot.slane %v1705_v39, 5  ;;  %v1733_v55 = vshll.u32 %v2271_v45, 16  ;;  %v1721_v60 = vrot.slane %v1719_v49, 5 }
  0x4b   : > { %2378 = vmatmul.mubr.msk.bf16.vlgmr.msra.gmra.mrb[0].mxu1 %vm490_vm1, %v2553_v52  ;;  %v1702_v50 = vor.u32 %v1701_v42, %v1698_v38  ;;  %v1724_v52 = vshrl.u32 %v2270_v43, 16  ;;  %v1729_v61 = vrot.slane %v1727_v54, 5 }
  0x4c   : > { %2436 = vmatpush3.bf16.msra.mxu1 %v2656_v3  ;;  %2381 = vmatprep.mubr.msk.bf16.mxu1 %vm490_vm1, %v2556_v5  ;;  %v1666_v3 = vsel %vm2734_vm4, %v1661_v29, %v1665_v9  ;;  %v1689_v10 = vrot.slane %v1688_v41, 4  ;;  %v1735_v4 = vrot.slane %v1733_v55, 5 }
  0x4d   : > { %v2274_v46 = vcombine.low %v1666_v3, %v1680_v40  ;;  %v1703_v57 = vrot.slane %v1702_v50, 4  ;;  %v1726_v58 = vrot.slane %v1724_v52, 4 }
  0x4e   : > { %v1694_v56 = vsel %vm2734_vm4, %v1689_v10, %v1693_v37 }
  0x4f   : > { %2422 = vmatmul.mubr.msk.bf16.gmra.mrb[4].mxu0 %vm490_vm1, %v2555_v53  ;;  %v1715_v53 = vrot.slane %v1713_v48, 5  ;;  %v1708_v62 = vsel %vm2734_vm4, %v1703_v57, %v1707_v47  ;;  %v1730_v2 = vor.u32 %v1729_v61, %v1726_v58 }
  0x50   : > { %2427 = vmatprep.mubr.msk.bf16.mxu0 %vm490_vm1, %v2273_v28  ;;  %v2275_v63 = vcombine.low %v1694_v56, %v1708_v62 }
  0x51   : > { %v1716_v59 = vor.u32 %v1715_v53, %v1712_v51  ;;  %v1731_v6 = vrot.slane %v1730_v2, 4 }
  0x53   : > { %2382 = vmatmul.mubr.msk.bf16.gmra.mrb[4].mxu1 %vm490_vm1, %v2557_v32  ;;  %v1717_v0 = vrot.slane %v1716_v59, 4  ;;  %v1736_v7 = vsel %vm2734_vm4, %v1731_v6, %v1735_v4 }
  0x54   : > { %2391 = vmatprep.mubr.msk.bf16.mxu1 %vm490_vm1, %v2558_v15 }
  0x55   : > { %v1722_v5 = vsel %vm2734_vm4, %v1717_v0, %v1721_v60 }
  0x56   : > { %v2276_v9 = vcombine.low %v1722_v5, %v1736_v7 }
  0x57   : > { %2428 = vmatmul.mubr.msk.bf16.vlgmr.msra.gmra.mrb[0].mxu0 %vm490_vm1, %v2274_v46 }
  0x58   : > { %2431 = vmatprep.mubr.msk.bf16.mxu0 %vm490_vm1, %v2275_v63 }
  0x5f   : > { %2432 = vmatmul.mubr.msk.bf16.gmra.mrb[4].mxu0 %vm490_vm1, %v2276_v9  ;;  %2392 = vmatmul.mubr.msk.bf16.vlgmr.msra.gmra.mrb[4].mxu1 %vm490_vm1, %v2559_v8 }
 0x11e   : > { %v2379_v11 = vpop.f32.mrb[0].mxu1 }
 0x11f   : > { %v984_v12 = vpop.f32.mrb[1].mxu1 }
 0x120   : > { %v2380_v13 = vpop.f32.mrb[2].mxu1 }
 0x121   : > { %v987_v14 = vpop.f32.mrb[3].mxu1 }
 0x12a   : > { %v2429_v17 = vpop.f32.mrb[0].mxu0 }
 0x12b   : > { %v2437_v18 = vadd.f32 %v2429_v17, %v2379_v11  ;;  %v1800_v19 = vpop.f32.mrb[1].mxu0 }
 0x12c   : > { %v2438_v44 = vadd.f32 %v1800_v19, %v984_v12  ;;  %v2430_v20 = vpop.f32.mrb[2].mxu0 }
 0x12d   : > { %v2294_v21 = vpack.c.bf16 %v2437_v18, %v2437_v18  ;;  %v2439_v22 = vadd.f32 %v2430_v20, %v2380_v13  ;;  %v1803_v24 = vpop.f32.mrb[3].mxu0  ;;  %v1905_v28 = vmul.f32 %v2437_v18, %v2437_v18  ;;  %v1883_v34 = vsel %vm490_vm1, %v2437_v18, 0.0 }
 0x12e   : > { %v2292_v25 = vpack.c.bf16 %v2438_v44, %v2438_v44  ;;  %v1903_v26 = vmul.f32 %v2438_v44, %v2438_v44  ;;  %v2440_v27 = vadd.f32 %v1803_v24, %v987_v14  ;;  %v1880_v30 = vsel %vm490_vm1, %v2438_v44, 0.0 }
 0x12f   : > { %1874 = vst.msk [vmem:[%s2910_s21 + $0x8] sm:$0xf] %vm1871_vm5, %v2294_v21  ;;  %v2295_v29 = vpack.c.bf16 %v2439_v22, %v2439_v22  ;;  %v1906_v36 = vmul.f32 %v2439_v22, %v2439_v22  ;;  %v1914_v39 = vsel %vm490_vm1, %v1905_v28, 0.0  ;;  %v1885_v16 = vsel %vm490_vm1, %v2439_v22, 0.0 }
 0x130   : > { %1872 = vst.msk [vmem:[%s2910_s21] sm:$0xf] %vm1871_vm5, %v2292_v25  ;;  %v2293_v31 = vpack.c.bf16 %v2440_v27, %v2440_v27  ;;  %v1881_v32 = vsel %vm490_vm1, %v2440_v27, 0.0  ;;  %v1904_v1 = vmul.f32 %v2440_v27, %v2440_v27  ;;  %v1911_v35 = vsel %vm490_vm1, %v1903_v26, 0.0 }
 0x131   : > { %1875 = vst.msk [vmem:[%s2910_s21 + $0xc] sm:$0xf] %vm1871_vm5, %v2295_v29  ;;  %v1882_v33 = vadd.f32 %v1881_v32, %v1880_v30  ;;  %v1916_v45 = vsel %vm490_vm1, %v1906_v36, 0.0 }
 0x132   : > { %1873 = vst.msk [vmem:[%s2910_s21 + $0x4] sm:$0xf] %vm1871_vm5, %v2293_v31  ;;  %v1912_v3 = vsel %vm490_vm1, %v1904_v1, 0.0  ;;  %v2433_v40 = vpop.f32.mrb[4].mxu0  ;;  %v2393_v23 = vpop.f32.mrb[4].mxu1 }
 0x133   : > { %v1884_v37 = vadd.f32 %v1883_v34, %v1882_v33  ;;  %v1913_v38 = vadd.f32 %v1912_v3, %v1911_v35  ;;  %v1816_v42 = vpop.f32.mrb[5].mxu0  ;;  %v2441_v15 = vadd.f32 %v2433_v40, %v2393_v23  ;;  %v1118_v47 = vpop.f32.mrb[5].mxu1 }
 0x134   : > { %v2434_v46 = vpop.f32.mrb[6].mxu0  ;;  %v2442_v10 = vadd.f32 %v1816_v42, %v1118_v47  ;;  %v2394_v50 = vpop.f32.mrb[6].mxu1 }
 0x135   : > { %v1915_v41 = vadd.f32 %v1914_v39, %v1913_v38  ;;  %v1886_v43 = vadd.f32 %v1885_v16, %v1884_v37  ;;  %v1819_v49 = vpop.f32.mrb[7].mxu0  ;;  %v2298_v51 = vpack.c.bf16 %v2441_v15, %v2441_v15  ;;  %v2443_v52 = vadd.f32 %v2434_v46, %v2394_v50  ;;  %v1121_v53 = vpop.f32.mrb[7].mxu1 }
 0x136   : > { %v2296_v54 = vpack.c.bf16 %v2442_v10, %v2442_v10  ;;  %v1887_v55 = vsel %vm490_vm1, %v2442_v10, 0.0  ;;  %v1907_v56 = vmul.f32 %v2442_v10, %v2442_v10  ;;  %v2444_v57 = vadd.f32 %v1819_v49, %v1121_v53 }
 0x137   : > { %v1917_v48 = vadd.f32 %v1916_v45, %v1915_v41  ;;  %1878 = vst.msk [vmem:[%s2910_s21 + $0x18] sm:$0xf] %vm1871_vm5, %v2298_v51  ;;  %v1888_v58 = vadd.f32 %v1887_v55, %v1886_v43  ;;  %v2299_v59 = vpack.c.bf16 %v2443_v52, %v2443_v52  ;;  %v1909_v63 = vmul.f32 %v2441_v15, %v2441_v15 }
 0x138   : > { %1876 = vst.msk [vmem:[%s2910_s21 + $0x10] sm:$0xf] %vm1871_vm5, %v2296_v54  ;;  %v1918_v60 = vsel %vm490_vm1, %v1907_v56, 0.0  ;;  %v2297_v61 = vpack.c.bf16 %v2444_v57, %v2444_v57  ;;  %v1889_v62 = vsel %vm490_vm1, %v2444_v57, 0.0  ;;  %v1908_v4 = vmul.f32 %v2444_v57, %v2444_v57 }
 0x139   : > { %v1919_v0 = vadd.f32 %v1918_v60, %v1917_v48  ;;  %1879 = vst.msk [vmem:[%s2910_s21 + $0x1c] sm:$0xf] %vm1871_vm5, %v2299_v59  ;;  %v1890_v2 = vadd.f32 %v1889_v62, %v1888_v58  ;;  %v1891_v5 = vsel %vm490_vm1, %v2441_v15, 0.0  ;;  %v1910_v6 = vmul.f32 %v2443_v52, %v2443_v52 }
 0x13a   : > { %1877 = vst.msk [vmem:[%s2910_s21 + $0x14] sm:$0xf] %vm1871_vm5, %v2297_v61  ;;  %v1920_v8 = vsel %vm490_vm1, %v1908_v4, 0.0  ;;  %v1893_v9 = vsel %vm490_vm1, %v2443_v52, 0.0  ;;  %v1922_v12 = vsel %vm490_vm1, %v1909_v63, 0.0 }
 0x13b   : > { %v1892_v7 = vadd.f32 %v1891_v5, %v1890_v2  ;;  %v1921_v11 = vadd.f32 %v1920_v8, %v1919_v0  ;;  %v1924_v17 = vsel %vm490_vm1, %v1910_v6, 0.0 }
 0x13d   : > { %v1894_v13 = vadd.f32 %v1893_v9, %v1892_v7  ;;  %v1923_v14 = vadd.f32 %v1922_v12, %v1921_v11 }
 0x13f   : > { %v1895_v18 = vrot.slane %v1894_v13, 4  ;;  %v1925_v19 = vadd.f32 %v1924_v17, %v1923_v14 }
 0x141   : > { %v1896_v44 = vadd.f32 %v1895_v18, %v1894_v13  ;;  %v1926_v20 = vrot.slane %v1925_v19, 4 }
 0x143   : > { %v1897_v21 = vrot.slane %v1896_v44, 2  ;;  %v1927_v22 = vadd.f32 %v1926_v20, %v1925_v19 }
 0x145   : > { %v1898_v24 = vadd.f32 %v1897_v21, %v1896_v44  ;;  %v1928_v25 = vrot.slane %v1927_v22, 2 }
 0x147   : > { %v1899_v26 = vrot.slane %v1898_v24, 1  ;;  %v1929_v27 = vadd.f32 %v1928_v25, %v1927_v22 }
 0x149   : > { %v1900_v28 = vadd.f32 %v1899_v26, %v1898_v24  ;;  %v1930_v29 = vrot.slane %v1929_v27, 1 }
 0x14b   : > { %1902 = vst.msk [vmem:[%s443_s23] sm:$0x1] %vm1901_vm6, %v1900_v28  ;;  %v1931_v30 = vadd.f32 %v1930_v29, %v1929_v27 }
 0x14d   : > { %1932 = vst.msk [vmem:[%s449_s30] sm:$0x1] %vm1901_vm6, %v1931_v30 }
 0x14e PF: > { %s18_s26 = sadd.s32 1, %s2582_s26   ;;  %s2971_s24 = smov %s2578_s25 }
 0x14f   : > { %p15_p5 = scmp.ge.s32.totalorder %s18_s26, 4   ;;  %s2972_s25 = smov %s2974_s27 }
 0x151   :  { %17 = sbr.rel (!%p15_p5) target bundleno = 2 (0x2), region = 113 }

</bundles_post_ra>
